<compile_context>
chip_gen: v7x
topology: tpu7x:2x2x1
jax: 0.10.0
libtpu: 0.0.40
codegen_flags: <defaults>
</compile_context>

<pallas_src>
import functools

import jax
import jax.numpy as jnp
from jax.experimental import pallas as pl
from jax.experimental.pallas import tpu as pltpu


def _round_up(n, m):
    return ((n + m - 1) // m) * m


def _pad_to(a, shape):
    pads = [(0, t - s) for s, t in zip(a.shape, shape)]
    if all(p == (0, 0) for p in pads):
        return a
    return jnp.pad(a, pads)


def _pick_tile(n):
    """Largest HBM/MXU-friendly tile dividing n (n is padded to 128k)."""
    for t in (1024, 512, 256, 128):
        if n % t == 0:
            return t
    return n  # unreachable once n is a multiple of 128


def _vmem_cap_bytes():
    """48 MiB ceiling on 64 MiB-VMEM parts (v7x); 96 MiB on 128 MiB parts."""
    try:
        phys = int(getattr(pltpu.get_tpu_info(), "vmem_capacity_bytes", 64 << 20))
    except Exception:
        phys = 64 << 20
    return (96 << 20) if phys >= (128 << 20) else (48 << 20)


def _kernel_ax_first(x_ref, a_ref, w_ref, o_ref, ax_ref, *, apply_relu,
                     compute_dtype, tk, x_resident):
    """out[row] += (sum_k A_s[row,k] @ X[k]) @ W_s   (D_in <= D_out path)."""
    s = pl.program_id(1)
    k = pl.program_id(2)
    n_s = pl.num_programs(1)
    n_k = pl.num_programs(2)

    @pl.when((s == 0) & (k == 0))
    def _():                               # first visit of this output tile
        o_ref[...] = jnp.zeros_like(o_ref)

    @pl.when(k == 0)
    def _():                               # new support: reset A@X accumulator
        ax_ref[...] = jnp.zeros_like(ax_ref)

    if x_resident:
        start = pl.multiple_of(k * tk, tk)
        x_blk = x_ref[pl.ds(start, tk), :]   # whole X resident; slice in-kernel
    else:
        x_blk = x_ref[...]

    # Big matmul: (tm, tk) @ (tk, D_in) on the MXU, bf16 feeds, f32 accumulate.
    ax_ref[...] += jnp.dot(a_ref[...].astype(compute_dtype),
                           x_blk.astype(compute_dtype),
                           preferred_element_type=jnp.float32)

    @pl.when(k == n_k - 1)
    def _():
        # Small matmul, once per (row tile, support); bf16 MXU feed with f32
        # accumulate (avoids the 3x-pass f32 MXU decomposition).
        w_s = w_ref[s]                       # fully resident weight stack
        o_ref[...] += jnp.dot(ax_ref[...].astype(compute_dtype),
                              w_s.astype(compute_dtype),
                              preferred_element_type=jnp.float32)

    @pl.when((s == n_s - 1) & (k == n_k - 1))
    def _():
        if apply_relu:
            o_ref[...] = jnp.maximum(o_ref[...], 0.0)


def _kernel_ap(a_ref, p_ref, o_ref, *, apply_relu, compute_dtype):
    """out[row] += A_s[row,k] @ P_s[k]  with P = X @ W precomputed wrapper-side."""
    s = pl.program_id(1)
    k = pl.program_id(2)

    @pl.when((s == 0) & (k == 0))
    def _():
        o_ref[...] = jnp.zeros_like(o_ref)

    o_ref[...] += jnp.dot(a_ref[...].astype(compute_dtype),
                          p_ref[...].astype(compute_dtype),
                          preferred_element_type=jnp.float32)

    @pl.when((s == pl.num_programs(1) - 1) & (k == pl.num_programs(2) - 1))
    def _():
        if apply_relu:
            o_ref[...] = jnp.maximum(o_ref[...], 0.0)


def graph_layer(x, supports, weights, *, apply_relu=False,
                compute_dtype=jnp.bfloat16, tm=None, tk=None):
    """x: (N, D_in); supports: (S, N, N); weights: (S, D_in, D_out) -> (N, D_out) f32."""
    N, D_in = x.shape
    S = supports.shape[0]
    D_out = weights.shape[-1]
    assert supports.shape == (S, N, N)
    assert weights.shape == (S, D_in, D_out)

    # Lane-dense padding: node dim and output dim to multiples of 128.
    N_p = _round_up(N, 128)
    D_out_p = _round_up(D_out, 128)

    x_p = _pad_to(x, (N_p, D_in))
    a_p = _pad_to(supports, (S, N_p, N_p))
    w_p = _pad_to(weights, (S, D_in, D_out_p))

    a_it = jnp.dtype(a_p.dtype).itemsize
    x_it = jnp.dtype(x_p.dtype).itemsize
    w_it = jnp.dtype(w_p.dtype).itemsize
    c_it = jnp.dtype(compute_dtype).itemsize

    auto_tm = tm is None
    tm = tm if tm is not None else _pick_tile(N_p)
    tk = tk if tk is not None else _pick_tile(N_p)
    # v7x: keep >= 2 blocks on the "parallel" row axis so both TensorCores work.
    if auto_tm and N_p // tm == 1:
        tm = N_p // 2
    assert N_p % tm == 0 and N_p % tk == 0

    cap = _vmem_cap_bytes()

    # Put the O(N^2) matmul on min(D_in, D_out_p).
    ax_first = D_in <= D_out_p

    if ax_first:
        x_resident = (N_p * D_in * x_it) <= (4 << 20)

        def need(tm_, tk_):
            return (2 * tm_ * tk_ * a_it
                    + (2 * N_p * D_in * x_it if x_resident
                       else 2 * tk_ * D_in * x_it)
                    + 2 * S * D_in * D_out_p * w_it
                    + 2 * tm_ * D_out_p * 4
                    + tm_ * D_in * 4)
    else:
        def need(tm_, tk_):
            return (2 * tm_ * tk_ * a_it
                    + 2 * tk_ * D_out_p * c_it
                    + 2 * tm_ * D_out_p * 4)

    # Shrink tiles until the working set fits; fail loudly otherwise.
    while need(tm, tk) > cap and (tm > 8 or tk > 128):
        if tk >= tm and tk > 128:
            tk //= 2
        elif tm > 8:
            tm //= 2
        else:
            tk //= 2
    if need(tm, tk) > cap:
        raise ValueError(
            f"GraphLayer working set {need(tm, tk)} B exceeds VMEM cap {cap} B")

    vmem_limit = int(min(max(2 * need(tm, tk), 16 << 20), cap))

    grid = (N_p // tm, S, N_p // tk)
    a_spec = pl.BlockSpec((None, tm, tk), lambda i, s, k: (s, i, k))
    o_spec = pl.BlockSpec((tm, D_out_p), lambda i, s, k: (i, 0))

    if ax_first:
        if x_resident:
            x_spec = pl.BlockSpec((N_p, D_in), lambda i, s, k: (0, 0))
        else:
            x_spec = pl.BlockSpec((tk, D_in), lambda i, s, k: (k, 0))
        w_spec = pl.BlockSpec((S, D_in, D_out_p), lambda i, s, k: (0, 0, 0))
        kernel = functools.partial(_kernel_ax_first, apply_relu=apply_relu,
                                   compute_dtype=compute_dtype, tk=tk,
                                   x_resident=x_resident)
        in_specs = [x_spec, a_spec, w_spec]
        operands = (x_p, a_p, w_p)
        scratch = [pltpu.VMEM((tm, D_in), jnp.float32)]
        flops = 2 * S * (N_p * N_p * D_in + N_p * D_in * D_out_p)
        bytes_accessed = (a_p.size * a_it + x_p.size * x_it
                          + w_p.size * w_it + N_p * D_out_p * 4)
    else:
        # Precompute XW_s once wrapper-side (O(N*D_in*D_out), cheap vs O(N^2)).
        pre = jnp.einsum("nd,sde->sne", x_p, w_p,
                         preferred_element_type=jnp.float32).astype(compute_dtype)
        p_spec = pl.BlockSpec((None, tk, D_out_p), lambda i, s, k: (s, k, 0))
        kernel = functools.partial(_kernel_ap, apply_relu=apply_relu,
                                   compute_dtype=compute_dtype)
        in_specs = [a_spec, p_spec]
        operands = (a_p, pre)
        scratch = []
        flops = 2 * S * N_p * N_p * D_out_p
        bytes_accessed = (a_p.size * a_it + (N_p // tm) * pre.size * c_it
                          + N_p * D_out_p * 4)

    out_p = pl.pallas_call(
        kernel,
        out_shape=jax.ShapeDtypeStruct((N_p, D_out_p), jnp.float32),
        grid_spec=pltpu.PrefetchScalarGridSpec(
            num_scalar_prefetch=0,
            grid=grid,
            in_specs=in_specs,
            out_specs=o_spec,
            scratch_shapes=scratch,
        ),
        compiler_params=pltpu.CompilerParams(
            dimension_semantics=("parallel", "arbitrary", "arbitrary"),
            vmem_limit_bytes=vmem_limit,
        ),
        cost_estimate=pl.CostEstimate(flops=flops, transcendentals=0,
                                      bytes_accessed=bytes_accessed),
    )(*operands)

    return out_p[:N, :D_out]


def _run_case(N, D_in, D_out, S, key):
    kx, ka, kw = jax.random.split(key, 3)
    x32 = jax.random.normal(kx, (N, D_in), dtype=jnp.float32)
    supports32 = jax.random.normal(ka, (S, N, N), dtype=jnp.float32)
    weights32 = jax.random.normal(kw, (S, D_in, D_out), dtype=jnp.float32)

    # Cast to bf16 wrapper-side: halves the dominant support HBM stream and
    # gives the MXU bf16 operands; accumulation stays f32 in-kernel.
    x = x32.astype(jnp.bfloat16)
    supports = supports32.astype(jnp.bfloat16)
    weights = weights32.astype(jnp.bfloat16)

    # dropout_rate = 0.0 -> identity; activision_func = ReLU; bias = False.
    out = graph_layer(x, supports, weights, apply_relu=True)
    out = jax.block_until_ready(out)

    # Pure-JAX f32 reference (PyTorch op order) from the same bf16 inputs.
    xs = x.astype(jnp.float32)
    ss = supports.astype(jnp.float32)
    ws = weights.astype(jnp.float32)
    ref = jnp.zeros((N, D_out), dtype=jnp.float32)
    for i in range(S):
        ref = ref + ss[i] @ (xs @ ws[i])
    ref = jnp.maximum(ref, 0.0)

    assert out.shape == (N, D_out)
    err = float(jnp.max(jnp.abs(out - ref)))
    tol = 1e-2 * float(jnp.max(jnp.abs(ref))) + 1e-3
    assert err <= tol, (err, tol)


if __name__ == "__main__":
    key = jax.random.PRNGKey(0)
    k1, k2 = jax.random.split(key)

    # Case 1: D_in <= D_out  -> in-kernel A@X-first path (ragged N padded).
    _run_case(N=64, D_in=32, D_out=128, S=2, key=k1)

    # Case 2: D_out < D_in   -> wrapper-side XW precompute, A@XW stream path
    # (exercises ragged N and D_out lane padding as well).
    _run_case(N=96, D_in=256, D_out=64, S=3, key=k2)

    print("KERNEL_OK")
</pallas_src>

<mosaic_0001>
module attributes {stable_mosaic.version = 11 : i64} {
  func.func @_kernel_ax_first(%arg0: i32, %arg1: i32, %arg2: i32, %arg3: memref<128x32xbf16, #tpu.memory_space<vmem>>, %arg4: memref<1x64x128xbf16, #tpu.memory_space<vmem>>, %arg5: memref<2x32x128xbf16, #tpu.memory_space<vmem>>, %arg6: memref<64x128xf32, #tpu.memory_space<vmem>>, %arg7: memref<64x32xf32, #tpu.memory_space<vmem>>) attributes {dimension_semantics = [#tpu.dimension_semantics<parallel>, #tpu.dimension_semantics<arbitrary>, #tpu.dimension_semantics<arbitrary>], iteration_bounds = array<i64: 2, 2, 1>, scalar_prefetch = 0 : i64, scratch_operands = 1 : i64, tpu.core_type = #tpu.core_type<tc>, window_params = [{pipeline_mode = #tpu.pipeline_mode<synchronous>, transform_indices = @transform_0, window_bounds = array<i64: 128, 32>}, {transform_indices = @transform_1, window_bounds = array<i64: 1, 64, 128>}, {pipeline_mode = #tpu.pipeline_mode<synchronous>, transform_indices = @transform_2, window_bounds = array<i64: 2, 32, 128>}, {transform_indices = @transform_3, window_bounds = array<i64: 64, 128>}]} {
    %c0_i32 = arith.constant 0 : i32
    %0 = arith.cmpi eq, %arg1, %c0_i32 : i32
    %c0_i32_0 = arith.constant 0 : i32
    %1 = arith.cmpi eq, %arg2, %c0_i32_0 : i32
    %2 = arith.andi %0, %1 : i1
    %3 = arith.extui %2 : i1 to i32
    %c0_i32_1 = arith.constant 0 : i32
    %4 = arith.cmpi ne, %3, %c0_i32_1 : i32
    scf.if %4 {
      %cst_15 = arith.constant 0.000000e+00 : f32
      %26 = vector.broadcast %cst_15 : f32 to vector<64x128xf32>
      %c0_16 = arith.constant 0 : index
      %c0_17 = arith.constant 0 : index
      %27 = vector.load %arg6[%c0_16, %c0_17] : memref<64x128xf32, #tpu.memory_space<vmem>>, vector<64x128xf32>
      tpu.vector_store %arg6[%c0_16, %c0_17], %26 {strides = array<i32>} : memref<64x128xf32, #tpu.memory_space<vmem>>, vector<64x128xf32>,
    } else {
    }
    %c0_i32_2 = arith.constant 0 : i32
    %5 = arith.cmpi eq, %arg2, %c0_i32_2 : i32
    %6 = arith.extui %5 : i1 to i32
    %c0_i32_3 = arith.constant 0 : i32
    %7 = arith.cmpi ne, %6, %c0_i32_3 : i32
    scf.if %7 {
      %cst_15 = arith.constant 0.000000e+00 : f32
      %26 = vector.broadcast %cst_15 : f32 to vector<64x32xf32>
      %c0_16 = arith.constant 0 : index
      %c0_17 = arith.constant 0 : index
      %27 = vector.load %arg7[%c0_16, %c0_17] : memref<64x32xf32, #tpu.memory_space<vmem>>, vector<64x32xf32>
      tpu.vector_store %arg7[%c0_16, %c0_17], %26 {strides = array<i32>} : memref<64x32xf32, #tpu.memory_space<vmem>>, vector<64x32xf32>,
    } else {
    }
    %c128_i32 = arith.constant 128 : i32
    %8 = arith.muli %arg2, %c128_i32 : i32
    %9 = tpu.assume_multiple %8, 128 : i32
    %10 = arith.index_cast %9 : i32 to index
    %c0 = arith.constant 0 : index
    %11 = vector.load %arg3[%10, %c0] : memref<128x32xbf16, #tpu.memory_space<vmem>>, vector<128x32xbf16>
    %c0_4 = arith.constant 0 : index
    %c0_5 = arith.constant 0 : index
    %12 = vector.load %arg7[%c0_4, %c0_5] : memref<64x32xf32, #tpu.memory_space<vmem>>, vector<64x32xf32>
    %c0_6 = arith.constant 0 : index
    %c0_7 = arith.constant 0 : index
    %c0_8 = arith.constant 0 : index
    %13 = vector.load %arg4[%c0_6, %c0_7, %c0_8] : memref<1x64x128xbf16, #tpu.memory_space<vmem>>, vector<1x64x128xbf16>
    %14 = vector.shape_cast %13 : vector<1x64x128xbf16> to vector<64x128xbf16>
    %cst = arith.constant dense<0.000000e+00> : vector<64x32xf32>
    %15 = tpu.matmul %14, %11, %cst {dimension_numbers = #tpu.dot_dimension_numbers<[1], [0], [0], [1], [0, 0, 1, 1], [], []>} : vector<64x128xbf16>, vector<128x32xbf16>, vector<64x32xf32> -> vector<64x32xf32>
    %16 = arith.addf %12, %15 : vector<64x32xf32>
    %c0_9 = arith.constant 0 : index
    %c0_10 = arith.constant 0 : index
    %17 = vector.load %arg7[%c0_9, %c0_10] : memref<64x32xf32, #tpu.memory_space<vmem>>, vector<64x32xf32>
    tpu.vector_store %arg7[%c0_9, %c0_10], %16 {strides = array<i32>} : memref<64x32xf32, #tpu.memory_space<vmem>>, vector<64x32xf32>,
    %c0_i32_11 = arith.constant 0 : i32
    %18 = arith.cmpi eq, %arg2, %c0_i32_11 : i32
    %19 = arith.extui %18 : i1 to i32
    %c0_i32_12 = arith.constant 0 : i32
    %20 = arith.cmpi ne, %19, %c0_i32_12 : i32
    scf.if %20 {
      %26 = arith.index_cast %arg1 : i32 to index
      %c0_15 = arith.constant 0 : index
      %c0_16 = arith.constant 0 : index
      %27 = vector.load %arg5[%26, %c0_15, %c0_16] : memref<2x32x128xbf16, #tpu.memory_space<vmem>>, vector<1x32x128xbf16>
      %28 = vector.shape_cast %27 : vector<1x32x128xbf16> to vector<32x128xbf16>
      %c0_17 = arith.constant 0 : index
      %c0_18 = arith.constant 0 : index
      %29 = vector.load %arg6[%c0_17, %c0_18] : memref<64x128xf32, #tpu.memory_space<vmem>>, vector<64x128xf32>
      %c0_19 = arith.constant 0 : index
      %c0_20 = arith.constant 0 : index
      %30 = vector.load %arg7[%c0_19, %c0_20] : memref<64x32xf32, #tpu.memory_space<vmem>>, vector<64x32xf32>
      %31 = arith.truncf %30 : vector<64x32xf32> to vector<64x32xbf16>
      %cst_21 = arith.constant dense<0.000000e+00> : vector<64x128xf32>
      %32 = tpu.matmul %31, %28, %cst_21 {dimension_numbers = #tpu.dot_dimension_numbers<[1], [0], [0], [1], [0, 0, 1, 1], [], []>} : vector<64x32xbf16>, vector<32x128xbf16>, vector<64x128xf32> -> vector<64x128xf32>
      %33 = arith.addf %29, %32 : vector<64x128xf32>
      %c0_22 = arith.constant 0 : index
      %c0_23 = arith.constant 0 : index
      %34 = vector.load %arg6[%c0_22, %c0_23] : memref<64x128xf32, #tpu.memory_space<vmem>>, vector<64x128xf32>
      tpu.vector_store %arg6[%c0_22, %c0_23], %33 {strides = array<i32>} : memref<64x128xf32, #tpu.memory_space<vmem>>, vector<64x128xf32>,
    } else {
    }
    %c1_i32 = arith.constant 1 : i32
    %21 = arith.cmpi eq, %arg1, %c1_i32 : i32
    %c0_i32_13 = arith.constant 0 : i32
    %22 = arith.cmpi eq, %arg2, %c0_i32_13 : i32
    %23 = arith.andi %21, %22 : i1
    %24 = arith.extui %23 : i1 to i32
    %c0_i32_14 = arith.constant 0 : i32
    %25 = arith.cmpi ne, %24, %c0_i32_14 : i32
    scf.if %25 {
      %c0_15 = arith.constant 0 : index
      %c0_16 = arith.constant 0 : index
      %26 = vector.load %arg6[%c0_15, %c0_16] : memref<64x128xf32, #tpu.memory_space<vmem>>, vector<64x128xf32>
      %cst_17 = arith.constant 0.000000e+00 : f32
      %27 = vector.broadcast %cst_17 : f32 to vector<64x128xf32>
      %28 = arith.maximumf %26, %27 : vector<64x128xf32>
      %c0_18 = arith.constant 0 : index
      %c0_19 = arith.constant 0 : index
      %29 = vector.load %arg6[%c0_18, %c0_19] : memref<64x128xf32, #tpu.memory_space<vmem>>, vector<64x128xf32>
      tpu.vector_store %arg6[%c0_18, %c0_19], %28 {strides = array<i32>} : memref<64x128xf32, #tpu.memory_space<vmem>>, vector<64x128xf32>,
    } else {
    }
    return
  }
  func.func @transform_0(%arg0: i32, %arg1: i32, %arg2: i32) -> (i32, i32) {
    %c0_i32 = arith.constant 0 : i32
    %c0_i32_0 = arith.constant 0 : i32
    %c0_i32_1 = arith.constant 0 : i32
    return %c0_i32, %c0_i32_0 : i32, i32
  }
  func.func @transform_1(%arg0: i32, %arg1: i32, %arg2: i32) -> (i32, i32, i32) {
    %c0_i32 = arith.constant 0 : i32
    return %arg1, %arg0, %arg2 : i32, i32, i32
  }
  func.func @transform_2(%arg0: i32, %arg1: i32, %arg2: i32) -> (i32, i32, i32) {
    %c0_i32 = arith.constant 0 : i32
    %c0_i32_0 = arith.constant 0 : i32
    %c0_i32_1 = arith.constant 0 : i32
    %c0_i32_2 = arith.constant 0 : i32
    return %c0_i32, %c0_i32_0, %c0_i32_1 : i32, i32, i32
  }
  func.func @transform_3(%arg0: i32, %arg1: i32, %arg2: i32) -> (i32, i32) {
    %c0_i32 = arith.constant 0 : i32
    %c0_i32_0 = arith.constant 0 : i32
    return %arg0, %c0_i32 : i32, i32
  }
}

</mosaic_0001>

<bundles_post_ra>
// kernel: tpu_custom_call.1
= control target key start
LH: loop header
LB: loop body
LE: loop exit
PB: predicated region body
PF: predicated region fallthrough
CT: control target
= control target key end

     0   :  { %8 = vsyncpa [#allocation4], 0  ;;  %s1433_s0 = inlined_call_operand.vmem [shape: bf16[128,32], index: 0, kind: input, shape index: {}]   ;;  %s1434_s1 = inlined_call_operand.hbm [shape: bf16[2,128,128], index: 1, kind: input, shape index: {}]   ;;  %s1435_s2 = inlined_call_operand.vmem [shape: bf16[2,32,128], index: 2, kind: input, shape index: {}]   ;;  %s1436_s3 = inlined_call_operand.hbm [shape: f32[128,128], index: 3, kind: output, shape index: {}]  }
   0x1   :  { %10 = vsyncpa [#allocation4 + $0x1], 0 }
   0x2   :  { %11 = vsyncpa [#allocation5], 0 }
   0x3   :  { %13 = vsyncpa [#allocation5 + $0x1], 0  ;;  %s1108_s12 = smov 0   ;;  %s1110_s13 = smov 0  }
   0x4   :  { %s1112_s14 = smov 0   ;;  %s1114_s15 = smov 0  }
   0x5   :  { %s1116_s16 = smov 0   ;;  %s1118_s17 = smov 0  }
   0x6   :  { %s1120_s18 = smov 0   ;;  %s1122_s19 = smov 0  }
   0x7   :  { %s1124_s20 = smov 0   ;;  %s1126_s21 = smov 0  }
   0x8   :  { %s1128_s22 = smov 0  }
   0x9 LB: > { %s708_s23 = sadd.s32 4294967295, %s1078_s22   ;;  %s709_s24 = sadd.s32 4294967294, %s1078_s22   ;;  %s1078_s22 = sphi %s1128_s22, %s19_s22   ;;  %s1074_s21 = sphi %s1126_s21, %s1462_s21   ;;  %s1070_s20 = sphi %s1124_s20, %s1461_s20   ;;  %s1066_s19 = sphi %s1122_s19, %s1460_s19   ;;  %s1062_s18 = sphi %s1120_s18, %s1459_s18   ;;  %s1058_s17 = sphi %s1118_s17, %s1458_s17   ;;  %s1054_s16 = sphi %s1116_s16, %s1457_s16   ;;  %s1050_s15 = sphi %s1114_s15, %s1456_s15   ;;  %s1046_s14 = sphi %s1112_s14, %s1455_s14   ;;  %s1042_s13 = sphi %s1110_s13, %s1454_s13   ;;  %s1038_s12 = sphi %s1108_s12, %s1453_s12  }
   0xa   : > { %s34_s25 = sadd.s32 1, %s1070_s20  ;;  %s38_s26 = sadd.s32 1, %s1074_s21 }
   0xb   : > { %p36_p0 = scmp.ge.s32.totalorder %s34_s25, 2  ;;  %s70_s27 = sadd.s32 1, %s1058_s17 }
   0xc   : > { %p77_p1 = scmp.ne.s32.totalorder %s1058_s17, %s1054_s16  ;;  %p78_p2 = scmp.eq.s32.totalorder %s1078_s22, 0 }
   0xd   : > { %s1464_s25 = smov (%p36_p0, %s34_s25), 0  ;;  %s1466_s26 = smov (!%p36_p0, %s38_s26), %s1074_s21 }
   0xe   : > { %1440 = sst [smem:[#allocation9_spill]] %s1464_s25  ;;  %s63_s28 = ssub.s32 %s1070_s20, %s1464_s25 }
   0xf   : > { %p1174_p3 = por %p78_p2, %p77_p1  ;;  %p40_p4 = scmp.ge.s32.totalorder %s1466_s26, 2 }
  0x10   : > { %p83_p5 = scmp.ne.s32.totalorder %s1054_s16, %s1050_s15  ;;  %p84_p6 = scmp.eq.s32.totalorder %s708_s23, 0 }
  0x11   : > { %s117_s30 = sadd.s32 1, %s1046_s14  ;;  %s1468_s26 = smov (%p40_p4, %s1466_s26), 0 }
  0x12   : > { %1442 = sst [smem:[#allocation10_spill]] %s1468_s26  ;;  %p1182_p7 = por %p84_p6, %p83_p5 }
  0x13   : > { %p127_p8 = scmp.ne.s32.totalorder %s1046_s14, %s1042_s13  ;;  %s64_s5 = ssub.s32 %s1074_s21, %s1468_s26 }
  0x14   : > { %p128_p9 = scmp.eq.s32.totalorder %s708_s23, 3  ;;  %s65_s6 = sor.u32 %s64_s5, %s63_s28 }
  0x15   : > { %p115_p10 = scmp.eq.s32.totalorder %s64_s5, 0  ;;  %p68_p11 = scmp.eq.s32.totalorder %s65_s6, 0 }
  0x16   : > { %p1190_p12 = por %p128_p9, %p127_p8  ;;  %p133_p13 = scmp.ne.s32.totalorder %s1042_s13, %s1038_s12 }
  0x17   : > { %s1195_s8 = scalar_select %p115_p10, %s1046_s14, %s117_s30  }
  0x18   : > { %s1444_s7 = scalar_select %p1190_p12, 1, 0 }
  0x19   : > { %s1198_s9 = scalar_select %p68_p11, %s1058_s17, %s70_s27  }
  0x1a   : > { %p134_p0 = scmp.eq.s32.totalorder %s709_s24, 3  ;;  %p816_p1 = scmp.lt.s32.totalorder %s1078_s22, 4 }
  0x1b   : > { %1445 = sst [smem:[#allocation11_spill]] %s1198_s9  ;;  %s160_s11 = sand.u32 1, %s1058_s17  }
  0x1c   : > { %p1203_p2 = por %p134_p0, %p133_p13  ;;  %s712_s15 = sshll.u32 %s160_s11, 5 }
  0x1d   : > { %s713_s23 = sshll.u32 %s1074_s21, 3  ;;  %s714_s28 = sshll.u32 %s1070_s20, 4 }
  0x1e   : > { %s1446_s10 = scalar_select %p1203_p2, 1, 0 }
  0x1f   : > { %s164_s5 = scalar_lea.vmem [#allocation3], %s712_s15  ;;  %s171_s26 = sadd.s32 %s714_s28, %s713_s23 }
  0x20   : > { %s174_s6 = sshll.u32 %s164_s5, 4  ;;  %s715_s30 = sshll.u32 %s171_s26, 6  ;;  %s1210_s6 = int_to_ptr.vmem [resolvable:$true] %s174_s6 }
  0x21   : > { %p1214_p4 = pnand %p816_p1, %p1174_p3  ;;  %s1221_s9 = scalar_lea.hbm %s1434_s1, %s715_s30 }
  0x22   : > { %s1223_s15 = scalar_lea.sflag [#allocation4], %s160_s11  ;;  %s926_s23 = scalar_lea.hbm %s1221_s9, 512 }
  0x23   : > { %p927_p5 = scmp.ne.s32.totalorder %s1221_s9, %s926_s23  ;;  %p928_p3 = pneg %p1214_p4 }
  0x24   : > { %s931_s29 = scalar_lea.hbm %s1434_s1, 2048  ;;  %p932_p9 = scmp.lt.u32.totalorder %s1221_s9, %s1434_s1 }
  0x25   : > { %p929_p6 = pnand %p928_p3, %p927_p5  ;;  %p933_p10 = scmp.lt.u32.totalorder %s931_s29, %s926_s23 }
  0x26   : > { %p935_p13 = scmp.lt.u32.totalorder %s926_s23, %s1221_s9 }
  0x27   : > { %p930_p8 = pneg %p929_p6  ;;  %p934_p11 = por %p933_p10, %p932_p9 }
  0x29   : > { %p936_p0 = por %p935_p13, %p934_p11 }
  0x2b   : > { %p937_p1 = pnand %p936_p0, %p930_p8 }
  0x2d   : > { %940 = shalt.err (!%p937_p1)
}
  0x2e   : > { %s941_s11 = scalar_lea.vmem %s1210_s6, 512  ;;  %s1080_s30 = smov [#allocation3]  }
  0x2f   : > { %p942_p5 = scmp.ne.s32.totalorder %s1210_s6, %s941_s11  ;;  %s946_s24 = sshll.u32 %s1080_s30, 4  ;;  %s947_s24 = int_to_ptr.vmem [resolvable:$false] %s946_s24 }
  0x30   : > { %s948_s26 = scalar_lea.vmem %s947_s24, 1024  ;;  %p949_p12 = scmp.lt.s32.totalorder %s1210_s6, %s947_s24 }
  0x31   : > { %p944_p6 = pnand %p942_p5, %p928_p3  ;;  %p950_p9 = scmp.lt.s32.totalorder %s948_s26, %s941_s11 }
  0x33   : > { %p945_p2 = pneg %p944_p6  ;;  %p951_p10 = por %p950_p9, %p949_p12 }
  0x35   : > { %p952_p11 = pnand %p951_p10, %p945_p2 }
  0x37   : > { %955 = shalt.err (!%p952_p11)
}
  0x38   : > { %s1081_s23 = smov 64   ;;  %s1082_s25 = smov 4  }
  0x39   : > { %811 = dma.hbm_to_vmem [thread:$0]  (!%p1214_p4), %s1221_s9, 512, %s1210_s6, %s1223_s15, %s1081_s23, %s1081_s23, %s1082_s25  }
  0x3a   : > { %p716_p3 = scmp.ge.s32.totalorder %s1078_s22, 1  ;;  %p182_p8 = scmp.lt.s32.totalorder %s1078_s22, 5 }
  0x3c   : > { %p183_p13 = pnand %p716_p3, %p182_p8 }
  0x3d   : > { %s188_s29 = sand.u32 (!%p183_p13), 1, %s1054_s16  }
  0x3e   : > { %186 = sbr.rel (%p183_p13) target bundleno = 602 (0x25a), region = 32  ;;  %s717_s28 = sshll.u32 (!%p183_p13), %s188_s29, 5 }
  0x3f   : > { %s189_s5 = scalar_lea.sflag (!%p183_p13), [#allocation4], %s188_s29  ;;  %s1254_s11 = scalar_lea.vmem (!%p183_p13), [#allocation3], %s717_s28 }
  0x45   : > { %1029 = dma.done.wait (%p1182_p7), %s189_s5, 512  }
  0x46   : > { %1031 = vsyncadd (%p1182_p7), %s189_s5, 4294966784  ;;  %s212_s9 = sand.u32 1, %s1042_s13   ;;  %p218_p12 = scmp.eq.s32.totalorder %s1062_s18, 0 }
  0x47   : > { %s718_s6 = sshll.u32 %s212_s9, 6  ;;  %v1083_v0 = vmov (%p218_p12), 0.0  }
  0x48   : > { %s1264_s27 = scalar_lea.vmem [#allocation6], %s718_s6  ;;  %223 = sbr.rel (!%p218_p12) target bundleno = 79 (0x4f), region = 40 }
  0x49   : > { %224 = vst [vmem:[%s1264_s27] sm:$0xff] (%p218_p12), %v1083_v0  ;;  %225 = vst [vmem:[%s1264_s27 + $0x8] sm:$0xff] (%p218_p12), %v1083_v0 }
  0x4a   : > { %226 = vst [vmem:[%s1264_s27 + $0x10] sm:$0xff] (%p218_p12), %v1083_v0  ;;  %227 = vst [vmem:[%s1264_s27 + $0x18] sm:$0xff] (%p218_p12), %v1083_v0 }
  0x4b   : > { %228 = vst [vmem:[%s1264_s27 + $0x20] sm:$0xff] (%p218_p12), %v1083_v0  ;;  %229 = vst [vmem:[%s1264_s27 + $0x28] sm:$0xff] (%p218_p12), %v1083_v0 }
  0x4c   : > { %230 = vst [vmem:[%s1264_s27 + $0x30] sm:$0xff] (%p218_p12), %v1083_v0  ;;  %231 = vst [vmem:[%s1264_s27 + $0x38] sm:$0xff] (%p218_p12), %v1083_v0 }
  0x4f PF: > { %v912_v1 = vld [vmem:[%s1433_s0] sm:$0xff]   ;;  %vm235_vm0 = vcmask 261120   ;;  %v913_v2 = vld [vmem:[%s1433_s0 + $0x8] sm:$0xff]   ;;  %v1084_v3 = vmov 0.0   ;;  %v914_v4 = vld [vmem:[%s1433_s0 + $0x10] sm:$0xff]   ;;  %s747_s23 = sshll.u32 %s1062_s18, 4 }
  0x50   : > { %768 = vmatprep.subr.bf16.mxu0 %v912_v1  ;;  %238 = vst.msk [vmem:[#allocation2 + $0x10] sm:$0xff] %vm235_vm0, %v1084_v3  ;;  %236 = vst.msk [vmem:[#allocation2] sm:$0xff] %vm235_vm0, %v1084_v3  ;;  %v915_v5 = vld [vmem:[%s1433_s0 + $0x18] sm:$0xff]   ;;  %v920_v6 = vld [vmem:[%s1254_s11] sm:$0xff]   ;;  %s440_s28 = scalar_lea.vmem %s1435_s2, %s747_s23  ;;  %p570_p7 = scmp.eq.s32.totalorder %s1062_s18, 1 }
  0x51   : > { %237 = vst.msk [vmem:[#allocation2 + $0x8] sm:$0xff] %vm235_vm0, %v1084_v3  ;;  %239 = vst.msk [vmem:[#allocation2 + $0x18] sm:$0xff] %vm235_vm0, %v1084_v3  ;;  %769 = vmatpush3.bf16.msra.mxu0 %v912_v1  ;;  %784 = vmatprep.mubr.bf16.mxu0 %v920_v6  ;;  %v916_v7 = vld [vmem:[%s1433_s0 + $0x20] sm:$0xff]   ;;  %v917_v8 = vld [vmem:[%s1433_s0 + $0x28] sm:$0xff]  }
  0x52   : > { %240 = vst.msk [vmem:[#allocation2 + $0x20] sm:$0xff] %vm235_vm0, %v1084_v3  ;;  %241 = vst.msk [vmem:[#allocation2 + $0x28] sm:$0xff] %vm235_vm0, %v1084_v3  ;;  %770 = vmatprep.subr.bf16.mxu0 %v913_v2  ;;  %v918_v9 = vld [vmem:[%s1433_s0 + $0x30] sm:$0xff]   ;;  %v919_v10 = vld [vmem:[%s1433_s0 + $0x38] sm:$0xff]  }
  0x53   : > { %242 = vst.msk [vmem:[#allocation2 + $0x30] sm:$0xff] %vm235_vm0, %v1084_v3  ;;  %243 = vst.msk [vmem:[#allocation2 + $0x38] sm:$0xff] %vm235_vm0, %v1084_v3  ;;  %v921_v11 = vld [vmem:[%s1254_s11 + $0x8] sm:$0xff]   ;;  %v922_v12 = vld [vmem:[%s1254_s11 + $0x10] sm:$0xff]  }
  0x54   : > { %v923_v13 = vld [vmem:[%s1254_s11 + $0x18] sm:$0xff]   ;;  %v924_v14 = vld [vmem:[%s440_s28] sm:$0xff]   ;;  %v925_v15 = vld [vmem:[%s440_s28 + $0x8] sm:$0xff]  }
  0x55   : > { %771 = vmatpush3.bf16.msra.mxu0 %v913_v2  ;;  %792 = vmatprep.subr.bf16.mxu1 %v924_v14  ;;  %v447_v52 = vld [vmem:[%s1264_s27 + $0x10] sm:$0xff]  ;;  %v445_v53 = vld [vmem:[%s1264_s27] sm:$0xff]  ;;  %v448_v55 = vld [vmem:[%s1264_s27 + $0x18] sm:$0xff] }
  0x56   : > { %772 = vmatprep.subr.bf16.mxu0 %v914_v4  ;;  %793 = vmatpush3.bf16.msra.mxu1 %v924_v14  ;;  %v446_v58 = vld [vmem:[%s1264_s27 + $0x8] sm:$0xff]  ;;  %v451_v0 = vld [vmem:[%s1264_s27 + $0x30] sm:$0xff]  ;;  %v449_v1 = vld [vmem:[%s1264_s27 + $0x20] sm:$0xff] }
  0x57   : > { %794 = vmatprep.subr.bf16.mxu1 %v925_v15  ;;  %v267_v16 = vld [vmem:[#allocation2 + $0x10] sm:$0xff]  ;;  %v265_v17 = vld [vmem:[#allocation2] sm:$0xff]  ;;  %v452_v3 = vld [vmem:[%s1264_s27 + $0x38] sm:$0xff] }
  0x58   : > { %v268_v19 = vld [vmem:[#allocation2 + $0x18] sm:$0xff]  ;;  %v266_v22 = vld [vmem:[#allocation2 + $0x8] sm:$0xff] }
  0x59   : > { %773 = vmatpush3.bf16.msra.mxu0 %v914_v4  ;;  %v269_v29 = vld [vmem:[#allocation2 + $0x20] sm:$0xff]  ;;  %v270_v34 = vld [vmem:[#allocation2 + $0x28] sm:$0xff] }
  0x5a   : > { %774 = vmatprep.subr.bf16.mxu0 %v915_v5  ;;  %795 = vmatpush3.bf16.msra.mxu1 %v925_v15  ;;  %v271_v28 = vld [vmem:[#allocation2 + $0x30] sm:$0xff]  ;;  %v272_v31 = vld [vmem:[#allocation2 + $0x38] sm:$0xff]  ;;  %v450_v6 = vld [vmem:[%s1264_s27 + $0x28] sm:$0xff] }
  0x5d   : > { %775 = vmatpush3.bf16.msra.mxu0 %v915_v5 }
  0x5e   : > { %776 = vmatprep.subr.bf16.mxu0 %v916_v7 }
  0x61   : > { %777 = vmatpush3.bf16.msra.mxu0 %v916_v7 }
  0x62   : > { %778 = vmatprep.subr.bf16.mxu0 %v917_v8 }
  0x65   : > { %779 = vmatpush3.bf16.msra.mxu0 %v917_v8 }
  0x66   : > { %780 = vmatprep.subr.bf16.mxu0 %v918_v9 }
  0x69   : > { %781 = vmatpush3.bf16.msra.mxu0 %v918_v9 }
  0x6a   : > { %782 = vmatprep.subr.bf16.mxu0 %v919_v10 }
  0x6d   : > { %783 = vmatpush3.bf16.msra.mxu0 %v919_v10 }
  0x70   : > { %785 = vmatmul.mubr.bf16.vlgmr.msra.gmra.mrb[0].mxu0 %v921_v11 }
  0x71   : > { %788 = vmatprep.mubr.bf16.mxu0 %v922_v12 }
  0x78   : > { %789 = vmatmul.mubr.bf16.gmra.mrb[4].mxu0 %v923_v13 }
 0x143   : > { %v786_v18 = vpop.f32.mrb[0].mxu0 }
 0x144   : > { %v420_v20 = vadd.f32 %v786_v18, %v267_v16  ;;  %v387_v21 = vpop.f32.mrb[1].mxu0 }
 0x145   : > { %v418_v23 = vadd.f32 %v387_v21, %v265_v17  ;;  %v787_v24 = vpop.f32.mrb[2].mxu0 }
 0x146   : > { %429 = vst.msk [vmem:[#allocation2 + $0x10] sm:$0xff] %vm235_vm0, %v420_v20  ;;  %v421_v25 = vadd.f32 %v787_v24, %v268_v19  ;;  %v390_v26 = vpop.f32.mrb[3].mxu0 }
 0x147   : > { %427 = vst.msk [vmem:[#allocation2] sm:$0xff] %vm235_vm0, %v418_v23  ;;  %v419_v27 = vadd.f32 %v390_v26, %v266_v22 }
 0x148   : > { %430 = vst.msk [vmem:[#allocation2 + $0x18] sm:$0xff] %vm235_vm0, %v421_v25 }
 0x149   : > { %428 = vst.msk [vmem:[#allocation2 + $0x8] sm:$0xff] %vm235_vm0, %v419_v27 }
 0x14b   : > { %v790_v30 = vpop.f32.mrb[4].mxu0 }
 0x14c   : > { %v424_v32 = vadd.f32 %v790_v30, %v271_v28  ;;  %v403_v33 = vpop.f32.mrb[5].mxu0 }
 0x14d   : > { %v422_v35 = vadd.f32 %v403_v33, %v269_v29  ;;  %v791_v36 = vpop.f32.mrb[6].mxu0  ;;  %v455_v44 = vld [vmem:[#allocation2 + $0x10] sm:$0xff] }
 0x14e   : > { %433 = vst.msk [vmem:[#allocation2 + $0x30] sm:$0xff] %vm235_vm0, %v424_v32  ;;  %v425_v37 = vadd.f32 %v791_v36, %v272_v31  ;;  %v406_v38 = vpop.f32.mrb[7].mxu0  ;;  %v453_v41 = vld [vmem:[#allocation2] sm:$0xff] }
 0x14f   : > { %431 = vst.msk [vmem:[#allocation2 + $0x20] sm:$0xff] %vm235_vm0, %v422_v35  ;;  %v423_v39 = vadd.f32 %v406_v38, %v270_v34  ;;  %v456_v40 = vld [vmem:[#allocation2 + $0x18] sm:$0xff] }
 0x150   : > { %434 = vst.msk [vmem:[#allocation2 + $0x38] sm:$0xff] %vm235_vm0, %v425_v37  ;;  %v454_v42 = vld [vmem:[#allocation2 + $0x8] sm:$0xff]  ;;  %v462_v45 = vpack.c.bf16 %v456_v40, %v455_v44 }
 0x151   : > { %432 = vst.msk [vmem:[#allocation2 + $0x28] sm:$0xff] %vm235_vm0, %v423_v39  ;;  %v461_v43 = vpack.c.bf16 %v454_v42, %v453_v41 }
 0x153   : > { %796 = vmatprep.mubr.msk.bf16.mxu1 %vm235_vm0, %v461_v43 }
 0x154   : > { %797 = vmatmul.mubr.msk.bf16.vlgmr.msra.gmra.mrb[0].mxu1 %vm235_vm0, %v462_v45 }
 0x155   : > { %v459_v50 = vld [vmem:[#allocation2 + $0x30] sm:$0xff] }
 0x156   : > { %v457_v47 = vld [vmem:[#allocation2 + $0x20] sm:$0xff] }
 0x157   : > { %v460_v46 = vld [vmem:[#allocation2 + $0x38] sm:$0xff] }
 0x158   : > { %v458_v48 = vld [vmem:[#allocation2 + $0x28] sm:$0xff]  ;;  %v464_v51 = vpack.c.bf16 %v460_v46, %v459_v50 }
 0x159   : > { %v463_v49 = vpack.c.bf16 %v458_v48, %v457_v47 }
 0x15b   : > { %800 = vmatprep.mubr.msk.bf16.mxu1 %vm235_vm0, %v463_v49 }
 0x15c   : > { %801 = vmatmul.mubr.msk.bf16.gmra.mrb[4].mxu1 %vm235_vm0, %v464_v51 }
 0x227   : > { %v798_v54 = vpop.f32.mrb[0].mxu1 }
 0x228   : > { %v556_v56 = vadd.f32 %v798_v54, %v447_v52  ;;  %v523_v57 = vpop.f32.mrb[1].mxu1 }
 0x229   : > { %v554_v59 = vadd.f32 %v523_v57, %v445_v53  ;;  %v799_v60 = vpop.f32.mrb[2].mxu1 }
 0x22a   : > { %564 = vst [vmem:[%s1264_s27 + $0x10] sm:$0xff] %v556_v56  ;;  %v557_v61 = vadd.f32 %v799_v60, %v448_v55  ;;  %v526_v62 = vpop.f32.mrb[3].mxu1 }
 0x22b   : > { %562 = vst [vmem:[%s1264_s27] sm:$0xff] %v554_v59  ;;  %v555_v63 = vadd.f32 %v526_v62, %v446_v58 }
 0x22c   : > { %565 = vst [vmem:[%s1264_s27 + $0x18] sm:$0xff] %v557_v61 }
 0x22d   : > { %563 = vst [vmem:[%s1264_s27 + $0x8] sm:$0xff] %v555_v63 }
 0x22f   : > { %v802_v2 = vpop.f32.mrb[4].mxu1  ;;  %574 = sbr.rel (!%p570_p7) target bundleno = 576 (0x240), region = 52 }
 0x230   : > { %v560_v4 = vadd.f32 %v802_v2, %v451_v0  ;;  %v539_v5 = vpop.f32.mrb[5].mxu1 }
 0x231   : > { %v558_v7 = vadd.f32 %v539_v5, %v449_v1  ;;  %v803_v8 = vpop.f32.mrb[6].mxu1  ;;  %v577_v14 = vld [vmem:[%s1264_s27 + $0x10] sm:$0xff] (%p570_p7) }
 0x232   : > { %568 = vst [vmem:[%s1264_s27 + $0x30] sm:$0xff] %v560_v4  ;;  %v561_v9 = vadd.f32 %v803_v8, %v452_v3  ;;  %v542_v10 = vpop.f32.mrb[7].mxu1  ;;  %v575_v12 = vld [vmem:[%s1264_s27] sm:$0xff] (%p570_p7)  ;;  %v585_v17 = vmax.f32 (%p570_p7), %v577_v14, 0.0 }
 0x233   : > { %566 = vst [vmem:[%s1264_s27 + $0x20] sm:$0xff] %v558_v7  ;;  %v559_v11 = vadd.f32 %v542_v10, %v450_v6  ;;  %v583_v15 = vmax.f32 (%p570_p7), %v575_v12, 0.0  ;;  %v578_v18 = vld [vmem:[%s1264_s27 + $0x18] sm:$0xff] (%p570_p7) }
 0x234   : > { %569 = vst [vmem:[%s1264_s27 + $0x38] sm:$0xff] %v561_v9  ;;  %v576_v13 = vld [vmem:[%s1264_s27 + $0x8] sm:$0xff] (%p570_p7)  ;;  %v586_v21 = vmax.f32 (%p570_p7), %v578_v18, 0.0  ;;  %593 = vst [vmem:[%s1264_s27 + $0x10] sm:$0xff] (%p570_p7), %v585_v17 }
 0x235   : > { %567 = vst [vmem:[%s1264_s27 + $0x28] sm:$0xff] %v559_v11  ;;  %v584_v16 = vmax.f32 (%p570_p7), %v576_v13, 0.0  ;;  %591 = vst [vmem:[%s1264_s27] sm:$0xff] (%p570_p7), %v583_v15 }
 0x236   : > { %594 = vst [vmem:[%s1264_s27 + $0x18] sm:$0xff] %v586_v21 }
 0x237   : > { %592 = vst [vmem:[%s1264_s27 + $0x8] sm:$0xff] %v584_v16 }
 0x239   : > { %v581_v24 = vld [vmem:[%s1264_s27 + $0x30] sm:$0xff] }
 0x23a   : > { %v579_v19 = vld [vmem:[%s1264_s27 + $0x20] sm:$0xff]  ;;  %v589_v26 = vmax.f32 %v581_v24, 0.0 }
 0x23b   : > { %v587_v22 = vmax.f32 %v579_v19, 0.0  ;;  %v582_v25 = vld [vmem:[%s1264_s27 + $0x38] sm:$0xff] }
 0x23c   : > { %v580_v20 = vld [vmem:[%s1264_s27 + $0x28] sm:$0xff]  ;;  %v590_v27 = vmax.f32 %v582_v25, 0.0  ;;  %597 = vst [vmem:[%s1264_s27 + $0x30] sm:$0xff] %v589_v26 }
 0x23d   : > { %v588_v23 = vmax.f32 %v580_v20, 0.0  ;;  %595 = vst [vmem:[%s1264_s27 + $0x20] sm:$0xff] %v587_v22 }
 0x23e   : > { %598 = vst [vmem:[%s1264_s27 + $0x38] sm:$0xff] %v590_v27 }
 0x23f   : > { %596 = vst [vmem:[%s1264_s27 + $0x28] sm:$0xff] %v588_v23 }
 0x240 PF: > { %s749_s18 = sshll.u32 %s1066_s19, 10  ;;  %s613_s4 = sshll.u32 %s1264_s27, 4  ;;  %s1368_s4 = int_to_ptr.vmem [resolvable:$true] %s613_s4 }
 0x241   : > { %s1365_s6 = scalar_lea.hbm %s1436_s3, %s749_s18  ;;  %s1372_s15 = scalar_lea.sflag [#allocation5], %s212_s9 }
 0x242   : > { %s956_s30 = scalar_lea.vmem %s1368_s4, 1024  ;;  %p1448_p4 = scmp.ne.s32.totalorder %s1444_s7, 0 }
 0x243   : > { %p957_p2 = scmp.ne.s32.totalorder %s1368_s4, %s956_s30  ;;  %s1085_s19 = smov [#allocation6]  }
 0x244   : > { %s960_s24 = sshll.u32 %s1085_s19, 4  ;;  %s961_s24 = int_to_ptr.vmem [resolvable:$false] %s960_s24 }
 0x245   : > { %p958_p0 = pnand %p957_p2, %p1448_p4  ;;  %s962_s26 = scalar_lea.vmem %s961_s24, 2048 }
 0x246   : > { %p963_p5 = scmp.lt.s32.totalorder %s1368_s4, %s961_s24  ;;  %p964_p6 = scmp.lt.s32.totalorder %s962_s26, %s956_s30 }
 0x247   : > { %p959_p1 = pneg %p958_p0 }
 0x248   : > { %p965_p9 = por %p964_p6, %p963_p5 }
 0x24a   : > { %p966_p10 = pnand %p965_p9, %p959_p1 }
 0x24c   : > { %969 = shalt.err (!%p966_p10)
}
 0x24d   : > { %s970_s9 = scalar_lea.hbm %s1365_s6, 1024  ;;  %s974_s25 = scalar_lea.hbm %s1436_s3, 2048 }
 0x24e   : > { %p971_p11 = scmp.ne.s32.totalorder %s1365_s6, %s970_s9  ;;  %p975_p13 = scmp.lt.u32.totalorder %s1365_s6, %s1436_s3 }
 0x24f   : > { %p976_p12 = scmp.lt.u32.totalorder %s974_s25, %s970_s9  ;;  %p978_p2 = scmp.lt.u32.totalorder %s970_s9, %s1365_s6 }
 0x250   : > { %p972_p3 = pnand %p971_p11, %p1448_p4 }
 0x251   : > { %p977_p7 = por %p976_p12, %p975_p13 }
 0x252   : > { %p973_p8 = pneg %p972_p3 }
 0x253   : > { %p979_p0 = por %p978_p2, %p977_p7 }
 0x255   : > { %p980_p1 = pnand %p979_p0, %p973_p8 }
 0x257   : > { %983 = shalt.err (!%p980_p1)
}
 0x258   : > { %s1086_s18 = smov 128   ;;  %s1087_s11 = smov 8  }
 0x259   : > { %806 = dma.vmem_to_hbm [thread:$0]  (%p1448_p4), %s1368_s4, 1024, %s1365_s6, %s1372_s15, %s1086_s18, %s1086_s18, %s1087_s11  }
 0x25a PF: > { %p817_p5 = scmp.ge.s32.totalorder %s1078_s22, 2  ;;  %s628_s5 = sand.u32 1, %s1038_s12  }
 0x25b   : > { %p1449_p6 = scmp.ne.s32.totalorder %s1446_s10, 0  ;;  %s629_s30 = scalar_lea.sflag [#allocation5], %s628_s5 }
 0x25d   : > { %p813_p9 = pnand %p817_p5, %p1449_p6 }
 0x25f   : > { %1033 = dma.done.wait (!%p813_p9), %s629_s30, 1024  }
 0x260   : > { %1035 = vsyncadd (!%p813_p9), %s629_s30, 4294966272  ;;  %s19_s22 = sadd.s32 1, %s1078_s22   ;;  %s1450_s7 = sld [smem:[#allocation11_spill]] }
 0x261   : > { %p16_p10 = scmp.ge.s32.totalorder %s19_s22, 6   ;;  %s1451_s6 = sld [smem:[#allocation9_spill]] }
 0x262   : > { %s1452_s4 = sld [smem:[#allocation10_spill]]  ;;  %s1453_s12 = smov %s1042_s13 }
 0x263   : > { %s1454_s13 = smov %s1046_s14  ;;  %s1455_s14 = smov %s1195_s8 }
 0x264   : > { %s1456_s15 = smov %s1054_s16  ;;  %s1457_s16 = smov %s1058_s17 }
 0x265   : > { %s1459_s18 = smov %s1070_s20  ;;  %s1460_s19 = smov %s1074_s21 }
 0x266   : > { %s1458_s17 = smov %s1450_s7  ;;  %18 = sbr.rel (!%p16_p10) target bundleno = 9 (0x9), region = 95 }
 0x267   : > { %s1461_s20 = smov %s1451_s6 }
 0x268   : > { %s1462_s21 = smov %s1452_s4 }
 0x26d   :  { %634 = vsyncpa [#allocation4], 1 }
 0x26e   :  { %636 = vsyncpa [#allocation4 + $0x1], 1 }
 0x26f   :  { %637 = vsyncpa [#allocation5], 1 }
 0x270   :  { %639 = vsyncpa [#allocation5 + $0x1], 1 }

</bundles_post_ra>
